<compile_context>
chip_gen: v5e
topology: v5e:2x2
jax: 0.10.0
libtpu: 0.0.40
codegen_flags: <defaults>
</compile_context>

<pallas_src>
import functools

import jax
import jax.numpy as jnp
from jax import lax
from jax.experimental import pallas as pl
from jax.experimental.pallas import tpu as pltpu


def _mha_kernel(x_ref, w_ref, o_ref, *, head_count, compute_dtype, approx_recip):
    # x_ref : (1, I, E)  current batch element
    # w_ref : (E, 3E)    full transposed qkv weight (resident across grid steps)
    # o_ref : (1, I, E)  lane-dense output (heads concatenated on last axis)
    x = x_ref[0].astype(compute_dtype)          # (I, E)
    w = w_ref[...].astype(compute_dtype)        # (E, 3E)

    # Fused QKV projection: one wide MXU matmul, f32 accumulation.
    qkv = jnp.dot(x, w, preferred_element_type=jnp.float32)   # (I, 3E)

    seq, e3 = qkv.shape
    embd = e3 // 3
    hd = embd // head_count

    q = qkv[:, 0 * embd:1 * embd]               # (I, E)
    k = qkv[:, 1 * embd:2 * embd]
    v = qkv[:, 2 * embd:3 * embd]

    # NOTE: the PyTorch module scales by x.shape[-1]**-0.5 AFTER q@k^T, i.e. by
    # the score matrix's last dim = sequence length I (here I == hd anyway).
    scale = jnp.float32(seq) ** -0.5

    # Causal (lower-triangular) mask; large finite negative instead of -inf so
    # a fully-masked row can never produce NaN if masks ever generalize.
    row = lax.broadcasted_iota(jnp.int32, (seq, seq), 0)
    col = lax.broadcasted_iota(jnp.int32, (seq, seq), 1)
    causal = col <= row

    outs = []
    for h in range(head_count):                 # static unrolled loop, H small
        qh = q[:, h * hd:(h + 1) * hd]          # (I, hd)
        kh = k[:, h * hd:(h + 1) * hd]
        vh = v[:, h * hd:(h + 1) * hd]

        # q·kᵀ via dot_general contracting last dims (no explicit K transpose).
        s = lax.dot_general(qh, kh, (((1,), (1,)), ((), ())),
                            preferred_element_type=jnp.float32)  # (I, I)
        s = s * scale
        s = jnp.where(causal, s, jnp.float32(-1e30))

        # softmax in f32
        s = s - jnp.max(s, axis=-1, keepdims=True)
        p = jnp.exp(s)
        denom = jnp.sum(p, axis=-1, keepdims=True)
        p = p * pl.reciprocal(denom, approx=approx_recip)

        # TODO(synk): dropout on attention probs is eval-mode identity here.

        oh = jnp.dot(p.astype(compute_dtype), vh.astype(compute_dtype),
                     preferred_element_type=jnp.float32)          # (I, hd)
        outs.append(oh)

    # Heads concatenated on the lane axis -> (I, E); single lane-dense store.
    o = jnp.concatenate(outs, axis=-1)
    o_ref[0] = o.astype(o_ref.dtype)


def multi_head_attention(x, w_qkv, head_count, *, compute_dtype=jnp.float32):
    """x: (B, I, E) float32; w_qkv: (3E, E) torch-style Linear weight (no bias)."""
    B, I, E = x.shape
    assert E % head_count == 0
    hd = E // head_count

    # torch: qkv(x) = x @ w_qkv.T — pass the full (E, 3E) weight once; head
    # slices are taken inside the kernel (no host-side per-head slabs).
    w_t = w_qkv.T                               # (E, 3E)

    approx_recip = (compute_dtype != jnp.float32)

    kernel = functools.partial(
        _mha_kernel,
        head_count=head_count,
        compute_dtype=compute_dtype,
        approx_recip=approx_recip,
    )

    # Advisory cost estimate for XLA scheduling around the custom call.
    flops = int(B * 2 * I * E * 3 * E              # fused qkv projection
                + B * 4 * I * I * E)               # q@k^T and p@v over all heads
    transcendentals = int(B * head_count * I * I + B * head_count * I)
    itemsize = jnp.dtype(x.dtype).itemsize
    bytes_accessed = int(2 * B * I * E * itemsize + 3 * E * E * itemsize)

    out = pl.pallas_call(
        kernel,
        out_shape=jax.ShapeDtypeStruct((B, I, E), x.dtype),
        grid=(B,),
        in_specs=[
            pl.BlockSpec((1, I, E), lambda b: (b, 0, 0)),      # x, per batch
            pl.BlockSpec((E, 3 * E), lambda b: (0, 0)),        # weight, resident
        ],
        out_specs=pl.BlockSpec((1, I, E), lambda b: (b, 0, 0)),  # lane-dense
        compiler_params=pltpu.CompilerParams(
            dimension_semantics=("parallel",),
            vmem_limit_bytes=64 * 1024 * 1024,
        ),
        cost_estimate=pl.CostEstimate(
            flops=flops,
            transcendentals=transcendentals,
            bytes_accessed=bytes_accessed,
        ),
    )(x, w_t)
    return out


def _reference(x, w_qkv, head_count):
    B, I, E = x.shape
    hd = E // head_count
    qkv = x @ w_qkv.T                              # (B, I, 3E)
    q, k, v = jnp.split(qkv, 3, axis=2)

    def heads(t):
        return jnp.transpose(t.reshape(B, I, head_count, hd), (0, 2, 1, 3))

    q, k, v = heads(q), heads(k), heads(v)
    s = q @ jnp.swapaxes(k, -2, -1)
    s = s * (s.shape[-1] ** -0.5)                  # module scales by seq len I
    mask = jnp.tril(jnp.ones((I, I), dtype=bool))
    s = jnp.where(mask[None, None], s, -jnp.inf)
    p = jax.nn.softmax(s, axis=-1)
    o = p @ v
    return jnp.transpose(o, (0, 2, 1, 3)).reshape(B, I, E)


if __name__ == "__main__":
    # MultiHead(embd_size=32, input_size=8, dropout=0.0, head_count=4)
    B, I, E, H = 2, 8, 32, 4

    key = jax.random.PRNGKey(0)
    kx, kw = jax.random.split(key)
    x = jax.random.normal(kx, (B, I, E), dtype=jnp.float32)
    # deterministic Linear weight init (shape (3E, E), no bias)
    w_qkv = (jax.random.uniform(kw, (3 * E, E), dtype=jnp.float32) - 0.5) \
        * (2.0 / (E ** 0.5))

    ref = _reference(x, w_qkv, H)

    # f32 compute path (exact reciprocal): tight tolerance vs reference.
    out_f32 = jax.block_until_ready(multi_head_attention(x, w_qkv, H))
    assert out_f32.shape == (B, I, E)
    assert jnp.allclose(out_f32, ref, atol=1e-5, rtol=1e-5), "f32 mismatch"

    # bf16 MXU compute path (v6e/v7x fast path): looser tolerance.
    out_bf16 = jax.block_until_ready(
        multi_head_attention(x, w_qkv, H, compute_dtype=jnp.bfloat16))
    assert out_bf16.shape == (B, I, E)
    assert jnp.allclose(out_bf16, ref, atol=5e-2, rtol=5e-2), "bf16 mismatch"

    print("KERNEL_OK")
</pallas_src>

<mosaic_0001>
module attributes {stable_mosaic.version = 11 : i64} {
  func.func @_mha_kernel(%arg0: i32, %arg1: memref<1x8x32xf32, #tpu.memory_space<vmem>>, %arg2: memref<32x96xf32, #tpu.memory_space<vmem>>, %arg3: memref<1x8x32xf32, #tpu.memory_space<vmem>>) attributes {dimension_semantics = [#tpu.dimension_semantics<parallel>], iteration_bounds = array<i64: 2>, scalar_prefetch = 0 : i64, scratch_operands = 0 : i64, tpu.core_type = #tpu.core_type<tc>, window_params = [{transform_indices = @transform_0, window_bounds = array<i64: 1, 8, 32>}, {pipeline_mode = #tpu.pipeline_mode<synchronous>, transform_indices = @transform_1, window_bounds = array<i64: 32, 96>}, {transform_indices = @transform_2, window_bounds = array<i64: 1, 8, 32>}]} {
    %c0 = arith.constant 0 : index
    %c0_0 = arith.constant 0 : index
    %c0_1 = arith.constant 0 : index
    %0 = vector.load %arg1[%c0, %c0_0, %c0_1] : memref<1x8x32xf32, #tpu.memory_space<vmem>>, vector<1x8x32xf32>
    %1 = vector.shape_cast %0 : vector<1x8x32xf32> to vector<8x32xf32>
    %c0_2 = arith.constant 0 : index
    %c0_3 = arith.constant 0 : index
    %2 = vector.load %arg2[%c0_2, %c0_3] : memref<32x96xf32, #tpu.memory_space<vmem>>, vector<32x96xf32>
    %cst = arith.constant dense<0.000000e+00> : vector<8x96xf32>
    %3 = tpu.matmul %1, %2, %cst {dimension_numbers = #tpu.dot_dimension_numbers<[1], [0], [0], [1], [0, 0, 1, 1], [], []>} : vector<8x32xf32>, vector<32x96xf32>, vector<8x96xf32> -> vector<8x96xf32>
    %4 = vector.extract_strided_slice %3 {offsets = [0, 0], sizes = [8, 32], strides = [1, 1]} : vector<8x96xf32> to vector<8x32xf32>
    %5 = vector.extract_strided_slice %3 {offsets = [0, 32], sizes = [8, 32], strides = [1, 1]} : vector<8x96xf32> to vector<8x32xf32>
    %6 = vector.extract_strided_slice %3 {offsets = [0, 64], sizes = [8, 32], strides = [1, 1]} : vector<8x96xf32> to vector<8x32xf32>
    %cst_4 = arith.constant 8.000000e+00 : f32
    %cst_5 = arith.constant -5.000000e-01 : f32
    %7 = math.powf %cst_4, %cst_5 : f32
    %8 = tpu.iota {dimensions = array<i32: 0>} : vector<8x8xi32>
    %9 = tpu.iota {dimensions = array<i32: 1>} : vector<8x8xi32>
    %10 = arith.cmpi sle, %9, %8 : vector<8x8xi32>
    %11 = vector.extract_strided_slice %4 {offsets = [0, 0], sizes = [8, 8], strides = [1, 1]} : vector<8x32xf32> to vector<8x8xf32>
    %12 = vector.extract_strided_slice %5 {offsets = [0, 0], sizes = [8, 8], strides = [1, 1]} : vector<8x32xf32> to vector<8x8xf32>
    %13 = vector.extract_strided_slice %6 {offsets = [0, 0], sizes = [8, 8], strides = [1, 1]} : vector<8x32xf32> to vector<8x8xf32>
    %cst_6 = arith.constant dense<0.000000e+00> : vector<8x8xf32>
    %14 = tpu.matmul %11, %12, %cst_6 {dimension_numbers = #tpu.dot_dimension_numbers<[1], [1], [0], [0], [0, 0, 1, 0], [], []>} : vector<8x8xf32>, vector<8x8xf32>, vector<8x8xf32> -> vector<8x8xf32>
    %15 = vector.broadcast %7 : f32 to vector<8x8xf32>
    %16 = arith.mulf %14, %15 : vector<8x8xf32>
    %cst_7 = arith.constant -1.000000e+30 : f32
    %17 = vector.broadcast %cst_7 : f32 to vector<8x8xf32>
    %18 = arith.select %10, %16, %17 : vector<8x8xi1>, vector<8x8xf32>
    %cst_8 = arith.constant dense<0xFF800000> : vector<8xf32>
    %19 = vector.multi_reduction <maximumf>, %18, %cst_8 [1] : vector<8x8xf32> to vector<8xf32>
    %20 = vector.shape_cast %19 : vector<8xf32> to vector<8x1xf32>
    %21 = vector.broadcast %20 : vector<8x1xf32> to vector<8x8xf32>
    %22 = arith.subf %18, %21 : vector<8x8xf32>
    %23 = math.exp %22 : vector<8x8xf32>
    %cst_9 = arith.constant dense<0.000000e+00> : vector<8xf32>
    %24 = vector.multi_reduction <add>, %23, %cst_9 [1] : vector<8x8xf32> to vector<8xf32>
    %25 = vector.shape_cast %24 : vector<8xf32> to vector<8x1xf32>
    %26 = tpu.reciprocal %25 : vector<8x1xf32> -> vector<8x1xf32>
    %27 = vector.broadcast %26 : vector<8x1xf32> to vector<8x8xf32>
    %28 = arith.mulf %23, %27 : vector<8x8xf32>
    %cst_10 = arith.constant dense<0.000000e+00> : vector<8x8xf32>
    %29 = tpu.matmul %28, %13, %cst_10 {dimension_numbers = #tpu.dot_dimension_numbers<[1], [0], [0], [1], [0, 0, 1, 1], [], []>} : vector<8x8xf32>, vector<8x8xf32>, vector<8x8xf32> -> vector<8x8xf32>
    %30 = vector.extract_strided_slice %4 {offsets = [0, 8], sizes = [8, 8], strides = [1, 1]} : vector<8x32xf32> to vector<8x8xf32>
    %31 = vector.extract_strided_slice %5 {offsets = [0, 8], sizes = [8, 8], strides = [1, 1]} : vector<8x32xf32> to vector<8x8xf32>
    %32 = vector.extract_strided_slice %6 {offsets = [0, 8], sizes = [8, 8], strides = [1, 1]} : vector<8x32xf32> to vector<8x8xf32>
    %cst_11 = arith.constant dense<0.000000e+00> : vector<8x8xf32>
    %33 = tpu.matmul %30, %31, %cst_11 {dimension_numbers = #tpu.dot_dimension_numbers<[1], [1], [0], [0], [0, 0, 1, 0], [], []>} : vector<8x8xf32>, vector<8x8xf32>, vector<8x8xf32> -> vector<8x8xf32>
    %34 = vector.broadcast %7 : f32 to vector<8x8xf32>
    %35 = arith.mulf %33, %34 : vector<8x8xf32>
    %cst_12 = arith.constant -1.000000e+30 : f32
    %36 = vector.broadcast %cst_12 : f32 to vector<8x8xf32>
    %37 = arith.select %10, %35, %36 : vector<8x8xi1>, vector<8x8xf32>
    %cst_13 = arith.constant dense<0xFF800000> : vector<8xf32>
    %38 = vector.multi_reduction <maximumf>, %37, %cst_13 [1] : vector<8x8xf32> to vector<8xf32>
    %39 = vector.shape_cast %38 : vector<8xf32> to vector<8x1xf32>
    %40 = vector.broadcast %39 : vector<8x1xf32> to vector<8x8xf32>
    %41 = arith.subf %37, %40 : vector<8x8xf32>
    %42 = math.exp %41 : vector<8x8xf32>
    %cst_14 = arith.constant dense<0.000000e+00> : vector<8xf32>
    %43 = vector.multi_reduction <add>, %42, %cst_14 [1] : vector<8x8xf32> to vector<8xf32>
    %44 = vector.shape_cast %43 : vector<8xf32> to vector<8x1xf32>
    %45 = tpu.reciprocal %44 : vector<8x1xf32> -> vector<8x1xf32>
    %46 = vector.broadcast %45 : vector<8x1xf32> to vector<8x8xf32>
    %47 = arith.mulf %42, %46 : vector<8x8xf32>
    %cst_15 = arith.constant dense<0.000000e+00> : vector<8x8xf32>
    %48 = tpu.matmul %47, %32, %cst_15 {dimension_numbers = #tpu.dot_dimension_numbers<[1], [0], [0], [1], [0, 0, 1, 1], [], []>} : vector<8x8xf32>, vector<8x8xf32>, vector<8x8xf32> -> vector<8x8xf32>
    %49 = vector.extract_strided_slice %4 {offsets = [0, 16], sizes = [8, 8], strides = [1, 1]} : vector<8x32xf32> to vector<8x8xf32>
    %50 = vector.extract_strided_slice %5 {offsets = [0, 16], sizes = [8, 8], strides = [1, 1]} : vector<8x32xf32> to vector<8x8xf32>
    %51 = vector.extract_strided_slice %6 {offsets = [0, 16], sizes = [8, 8], strides = [1, 1]} : vector<8x32xf32> to vector<8x8xf32>
    %cst_16 = arith.constant dense<0.000000e+00> : vector<8x8xf32>
    %52 = tpu.matmul %49, %50, %cst_16 {dimension_numbers = #tpu.dot_dimension_numbers<[1], [1], [0], [0], [0, 0, 1, 0], [], []>} : vector<8x8xf32>, vector<8x8xf32>, vector<8x8xf32> -> vector<8x8xf32>
    %53 = vector.broadcast %7 : f32 to vector<8x8xf32>
    %54 = arith.mulf %52, %53 : vector<8x8xf32>
    %cst_17 = arith.constant -1.000000e+30 : f32
    %55 = vector.broadcast %cst_17 : f32 to vector<8x8xf32>
    %56 = arith.select %10, %54, %55 : vector<8x8xi1>, vector<8x8xf32>
    %cst_18 = arith.constant dense<0xFF800000> : vector<8xf32>
    %57 = vector.multi_reduction <maximumf>, %56, %cst_18 [1] : vector<8x8xf32> to vector<8xf32>
    %58 = vector.shape_cast %57 : vector<8xf32> to vector<8x1xf32>
    %59 = vector.broadcast %58 : vector<8x1xf32> to vector<8x8xf32>
    %60 = arith.subf %56, %59 : vector<8x8xf32>
    %61 = math.exp %60 : vector<8x8xf32>
    %cst_19 = arith.constant dense<0.000000e+00> : vector<8xf32>
    %62 = vector.multi_reduction <add>, %61, %cst_19 [1] : vector<8x8xf32> to vector<8xf32>
    %63 = vector.shape_cast %62 : vector<8xf32> to vector<8x1xf32>
    %64 = tpu.reciprocal %63 : vector<8x1xf32> -> vector<8x1xf32>
    %65 = vector.broadcast %64 : vector<8x1xf32> to vector<8x8xf32>
    %66 = arith.mulf %61, %65 : vector<8x8xf32>
    %cst_20 = arith.constant dense<0.000000e+00> : vector<8x8xf32>
    %67 = tpu.matmul %66, %51, %cst_20 {dimension_numbers = #tpu.dot_dimension_numbers<[1], [0], [0], [1], [0, 0, 1, 1], [], []>} : vector<8x8xf32>, vector<8x8xf32>, vector<8x8xf32> -> vector<8x8xf32>
    %68 = vector.extract_strided_slice %4 {offsets = [0, 24], sizes = [8, 8], strides = [1, 1]} : vector<8x32xf32> to vector<8x8xf32>
    %69 = vector.extract_strided_slice %5 {offsets = [0, 24], sizes = [8, 8], strides = [1, 1]} : vector<8x32xf32> to vector<8x8xf32>
    %70 = vector.extract_strided_slice %6 {offsets = [0, 24], sizes = [8, 8], strides = [1, 1]} : vector<8x32xf32> to vector<8x8xf32>
    %cst_21 = arith.constant dense<0.000000e+00> : vector<8x8xf32>
    %71 = tpu.matmul %68, %69, %cst_21 {dimension_numbers = #tpu.dot_dimension_numbers<[1], [1], [0], [0], [0, 0, 1, 0], [], []>} : vector<8x8xf32>, vector<8x8xf32>, vector<8x8xf32> -> vector<8x8xf32>
    %72 = vector.broadcast %7 : f32 to vector<8x8xf32>
    %73 = arith.mulf %71, %72 : vector<8x8xf32>
    %cst_22 = arith.constant -1.000000e+30 : f32
    %74 = vector.broadcast %cst_22 : f32 to vector<8x8xf32>
    %75 = arith.select %10, %73, %74 : vector<8x8xi1>, vector<8x8xf32>
    %cst_23 = arith.constant dense<0xFF800000> : vector<8xf32>
    %76 = vector.multi_reduction <maximumf>, %75, %cst_23 [1] : vector<8x8xf32> to vector<8xf32>
    %77 = vector.shape_cast %76 : vector<8xf32> to vector<8x1xf32>
    %78 = vector.broadcast %77 : vector<8x1xf32> to vector<8x8xf32>
    %79 = arith.subf %75, %78 : vector<8x8xf32>
    %80 = math.exp %79 : vector<8x8xf32>
    %cst_24 = arith.constant dense<0.000000e+00> : vector<8xf32>
    %81 = vector.multi_reduction <add>, %80, %cst_24 [1] : vector<8x8xf32> to vector<8xf32>
    %82 = vector.shape_cast %81 : vector<8xf32> to vector<8x1xf32>
    %83 = tpu.reciprocal %82 : vector<8x1xf32> -> vector<8x1xf32>
    %84 = vector.broadcast %83 : vector<8x1xf32> to vector<8x8xf32>
    %85 = arith.mulf %80, %84 : vector<8x8xf32>
    %cst_25 = arith.constant dense<0.000000e+00> : vector<8x8xf32>
    %86 = tpu.matmul %85, %70, %cst_25 {dimension_numbers = #tpu.dot_dimension_numbers<[1], [0], [0], [1], [0, 0, 1, 1], [], []>} : vector<8x8xf32>, vector<8x8xf32>, vector<8x8xf32> -> vector<8x8xf32>
    %87 = tpu.concatenate %29, %48, %67, %86 in 1 : vector<8x8xf32>, vector<8x8xf32>, vector<8x8xf32>, vector<8x8xf32> -> vector<8x32xf32>
    %c0_26 = arith.constant 0 : index
    %c0_27 = arith.constant 0 : index
    %c0_28 = arith.constant 0 : index
    %88 = vector.load %arg3[%c0_26, %c0_27, %c0_28] : memref<1x8x32xf32, #tpu.memory_space<vmem>>, vector<1x8x32xf32>
    %89 = vector.shape_cast %88 : vector<1x8x32xf32> to vector<8x32xf32>
    %90 = vector.shape_cast %87 : vector<8x32xf32> to vector<1x8x32xf32>
    tpu.vector_store %arg3[%c0_26, %c0_27, %c0_28], %90 {strides = array<i32>} : memref<1x8x32xf32, #tpu.memory_space<vmem>>, vector<1x8x32xf32>,
    return
  }
  func.func @transform_0(%arg0: i32) -> (i32, i32, i32) {
    %c0_i32 = arith.constant 0 : i32
    %c0_i32_0 = arith.constant 0 : i32
    %c0_i32_1 = arith.constant 0 : i32
    return %arg0, %c0_i32, %c0_i32_0 : i32, i32, i32
  }
  func.func @transform_1(%arg0: i32) -> (i32, i32) {
    %c0_i32 = arith.constant 0 : i32
    %c0_i32_0 = arith.constant 0 : i32
    %c0_i32_1 = arith.constant 0 : i32
    return %c0_i32, %c0_i32_0 : i32, i32
  }
  func.func @transform_2(%arg0: i32) -> (i32, i32, i32) {
    %c0_i32 = arith.constant 0 : i32
    %c0_i32_0 = arith.constant 0 : i32
    %c0_i32_1 = arith.constant 0 : i32
    return %arg0, %c0_i32, %c0_i32_0 : i32, i32, i32
  }
}

</mosaic_0001>

<bundles_post_ra>
// kernel: tpu_custom_call.1
= control target key start
LH: loop header
LB: loop body
LE: loop exit
PB: predicated region body
PF: predicated region fallthrough
CT: control target
= control target key end

     0   :  { %7 = vsyncpa [#allocation3], 0  ;;  %s1126_s0 = inlined_call_operand.hbm [shape: f32[2,8,32], index: 0, kind: input, shape index: {}]   ;;  %s1127_s1 = inlined_call_operand.hbm [shape: f32[32,96], index: 1, kind: input, shape index: {}]   ;;  %s1128_s2 = inlined_call_operand.hbm [shape: f32[2,8,32], index: 2, kind: output, shape index: {}]  }
   0x1   :  { %9 = vsyncpa [#allocation3 + $0x1], 0 }
   0x2   :  { %10 = vsyncpa [#allocation6], 0 }
   0x3   :  { %11 = vsyncpa [#allocation4], 0 }
   0x4   :  { %13 = vsyncpa [#allocation4 + $0x1], 0  ;;  %s926_s9 = smov 0   ;;  %s928_s10 = smov 0  }
   0x5   :  { %s930_s11 = smov 0   ;;  %s932_s12 = smov 0  }
   0x6 LB: > { %s108_s15 = sshll.u32 %s1127_s1, 4  ;;  %s950_s16 = sadd.s32 4294967295, %s892_s12   ;;  %s892_s12 = sphi %s932_s12, %s1138_s12   ;;  %s888_s11 = sphi %s930_s11, %s1137_s11   ;;  %s884_s10 = sphi %s928_s10, %s1136_s10   ;;  %s880_s9 = sphi %s926_s9, %s1135_s9   ;;  %s109_s15 = int_to_ptr.hbm [resolvable:$true] %s108_s15 }
   0x7   : > { %p647_p0 = scmp.ge.s32.totalorder %s892_s12, 1  ;;  %p40_p1 = scmp.eq.s32.totalorder %s950_s16, 0 }
   0x8   : > { %p97_p2 = scmp.lt.s32.totalorder %s892_s12, 3  ;;  %s894_s18 = smov [#allocation5]  }
   0x9   : > { %s110_s19 = sshll.u32 %s894_s18, 4  ;;  %s895_s20 = smov 128   ;;  %s111_s19 = int_to_ptr.vmem [resolvable:$true] %s110_s19 }
   0xa   : > { %p955_p3 = pnand %p647_p0, %p97_p2  ;;  %s896_s21 = smov 8  }
   0xb   : > { %s646_s22 = sadd.s32 4294967294, %s892_s12   ;;  %s966_s23 = sadd.s32 1, %s892_s12  }
   0xc   : > { %p681_p4 = pneg %p955_p3  ;;  %s26_s24 = sadd.s32 1, %s888_s11 }
   0xd   : > { %s23_s25 = ssub.s32 %s892_s12, %s966_s23  ;;  %p33_p7 = scmp.ne.s32.totalorder %s888_s11, %s884_s10 }
   0xe   : > { %p682_p6 = pnand %p681_p4, %p40_p1  ;;  %p24_p8 = scmp.eq.s32.totalorder %s23_s25, 0 }
   0xf   : > { %p34_p9 = scmp.eq.s32.totalorder %s892_s12, 0  ;;  %p39_p10 = scmp.ne.s32.totalorder %s884_s10, %s880_s9 }
  0x10   : > { %684 = dma.hbm_to_vmem [thread:$0]  (!%p682_p6), %s109_s15, 512, %s111_s19, [#allocation6], %s895_s20, %s895_s20, %s896_s21  }
  0x11   : > { %p84_p11 = scmp.eq.s32.totalorder %s950_s16, 1  ;;  %p982_p12 = por %p40_p1, %p39_p10 }
  0x12   : > { %s978_s26 = scalar_select %p24_p8, %s888_s11, %s26_s24  }
  0x13   : > { %p986_p13 = por %p84_p11, %p33_p7  ;;  %p90_p0 = scmp.eq.s32.totalorder %s646_s22, 1 }
  0x14   : > { %p35_p2 = por %p34_p9, %p33_p7  ;;  %s124_s29 = sand.u32 1, %s888_s11  }
  0x15   : > { %p991_p4 = por %p90_p0, %p39_p10  ;;  %p694_p6 = scmp.lt.s32.totalorder %s892_s12, 2 }
  0x16   : > { %s650_s3 = sshll.u32 %s124_s29, 3  ;;  %s651_s4 = sshll.u32 %s892_s12, 3 }
  0x17   : > { %s132_s7 = scalar_lea.hbm %s1126_s0, %s651_s4  ;;  %s128_s13 = scalar_lea.vmem [#allocation2], %s650_s3 }
  0x18   : > { %s134_s8 = sshll.u32 %s132_s7, 4  ;;  %s136_s14 = sshll.u32 %s128_s13, 4  ;;  %s135_s8 = int_to_ptr.hbm [resolvable:$true] %s134_s8  ;;  %s137_s14 = int_to_ptr.vmem [resolvable:$true] %s136_s14 }
  0x19   : > { %p1000_p8 = pnand %p694_p6, %p35_p2  ;;  %s125_s18 = scalar_lea.sflag [#allocation3], %s124_s29 }
  0x1a   : > { %s792_s19 = sshra.s32 %s135_s8, 4  ;;  %s799_s24 = scalar_lea.hbm %s1126_s0, 16  ;;  %s793_s19 = int_to_ptr.hbm [resolvable:$true] %s792_s19 }
  0x1b   : > { %s794_s20 = scalar_lea.hbm %s793_s19, 8  ;;  %p796_p9 = pneg %p1000_p8 }
  0x1c   : > { %p795_p7 = scmp.ne.s32.totalorder %s793_s19, %s794_s20  ;;  %p800_p0 = scmp.lt.s32.totalorder %s793_s19, %s1126_s0 }
  0x1d   : > { %p801_p2 = scmp.lt.s32.totalorder %s799_s24, %s794_s20 }
  0x1e   : > { %p797_p10 = pnand %p796_p9, %p795_p7 }
  0x1f   : > { %p802_p6 = por %p801_p2, %p800_p0 }
  0x20   : > { %p798_p11 = pneg %p797_p10 }
  0x22   : > { %p803_p5 = pnand %p802_p6, %p798_p11 }
  0x24   : > { %806 = shalt.err (!%p803_p5)
}
  0x25   : > { %688 = dma.hbm_to_vmem [thread:$0]  (!%p1000_p8), %s135_s8, 128, %s137_s14, %s125_s18  }
  0x26   : > { %145 = sbr.rel (%p955_p3) target bundleno = 972 (0x3cc), region = 28  ;;  %s1017_s29 = sand.u32 (!%p955_p3), 1, %s884_s10  }
  0x27   : > { %s653_s4 = sshll.u32 (!%p955_p3), %s1017_s29, 3  ;;  %s148_s5 = scalar_lea.sflag (!%p955_p3), [#allocation3], %s1017_s29 }
  0x28   : > { %s151_s6 = scalar_lea.vmem (!%p955_p3), [#allocation2], %s653_s4 }
  0x2b   : > { %867 = dma.done.wait (%p982_p12), %s148_s5, 128  }
  0x2c   : > { %869 = vsyncadd (%p982_p12), %s148_s5, 4294967168 }
  0x2d   : > { %871 = dma.done.wait (%p40_p1), [#allocation6], 512  }
  0x2e   : > { %873 = vsyncadd (%p40_p1), [#allocation6], 4294966784  ;;  %v182_v0 = vld [vmem:[#allocation5 + $0x18] sm:$0xff]  ;;  %v181_v1 = vld [vmem:[#allocation5 + $0x10] sm:$0xff]  ;;  %vm183_vm0 = vcmask 261120   ;;  %s897_s17 = smov 72   ;;  %v207_v13 = vlaneseq }
  0x2f   : > { %199 = vmatpush.msra.mxu0 %v182_v0  ;;  %v180_v2 = vld [vmem:[#allocation5 + $0x8] sm:$0xff]  ;;  %v179_v3 = vld [vmem:[#allocation5] sm:$0xff]  ;;  %v178_v4 = vld [vmem:[%s151_s6] sm:$0xff]  ;;  %s898_s27 = smov 120   ;;  %s899_s7 = smov 96   ;;  %vm215_vm1 = vcmask 64512  }
  0x30   : > { %s900_s8 = smov 112   ;;  %s901_s13 = smov 80   ;;  %v208_v14 = vshrl.u32 %v207_v13, 7  ;;  %v210_v15 = vand.u32 127, %v207_v13 }
  0x31   : > { %200 = vmatpush.msra.mxu0 %v181_v1  ;;  %s902_s14 = smov 88   ;;  %s903_s15 = smov 104  }
  0x32   : > { %vm211_vm2 = vcmp.le.s32.totalorder %v210_v15, %v208_v14  ;;  %s904_s18 = smov 56   ;;  %s905_s19 = smov 40  }
  0x33   : > { %201 = vmatpush.msra.mxu0 %v180_v2  ;;  %s906_s20 = smov 64   ;;  %s907_s21 = smov 48  }
  0x34   : > { %s908_s22 = smov 8   ;;  %s909_s24 = smov 24  }
  0x35   : > { %202 = vmatpush.msra.mxu0 %v179_v3  ;;  %s910_s25 = smov 16   ;;  %s670_s3 = sshll.u32 %s950_s16, 3 }
  0x36   : > { %656 = vmatmul.msk.f32.vlgmr.msra.gmra.mxu0 %vm183_vm0, %v178_v4  ;;  %s551_s16 = scalar_lea.sflag [#allocation4], %s1017_s29 }
  0xb3   : > { %v1032_v5 = vpop.f32.mrf.mxu0 }
  0xb4   : > { %454 = vrot.lane.b32.xlu2 %v1032_v5, %s897_s17  ;;  %292 = vrot.lane.b32.xlu1 %v1032_v5, %s898_s27  ;;  %s561_s17 = scalar_lea.hbm %s1128_s2, %s670_s3  ;;  %s177_s27 = scalar_lea.vmem [#allocation7], %s653_s4 }
  0xb5   : > { %213 = vrot.lane.b32.xlu0 %v1032_v5, %s899_s7  ;;  %s563_s7 = sshll.u32 %s177_s27, 4  ;;  %s564_s7 = int_to_ptr.vmem [resolvable:$true] %s563_s7 }
  0xbc   : > { %372 = vrot.lane.b32.xlu2 %v1032_v5, %s900_s8  ;;  %374 = vrot.lane.b32.xlu1 %v1032_v5, %s901_s13  ;;  %s565_s8 = sshll.u32 %s561_s17, 4  ;;  %s566_s8 = int_to_ptr.hbm [resolvable:$true] %s565_s8 }
  0xbd   : > { %294 = vrot.lane.b32.xlu0 %v1032_v5, %s902_s14  ;;  %s836_s13 = sshra.s32 %s566_s8, 4  ;;  %s837_s13 = int_to_ptr.hbm [resolvable:$true] %s836_s13 }
  0xbe   : > { %s838_s14 = scalar_lea.hbm %s837_s13, 8  ;;  %p843_p12 = scmp.lt.s32.totalorder %s837_s13, %s1128_s2 }
  0xbf   : > { %p839_p1 = scmp.ne.s32.totalorder %s837_s13, %s838_s14 }
  0xc1   : > { %p840_p3 = pnand %p839_p1, %p986_p13 }
  0xc3   : > { %p841_p5 = pneg %p840_p3 }
  0xc5   : > { %452 = vrot.lane.b32.xlu0 %v1032_v5, %s903_s15 }
 0x10e   : > { %v455_v6 = vpop.permute.xlu2 %454 }
 0x10f   : > { %666 = vmatpush.xpose.msk.msrb.mxu0 %vm215_vm1, %v455_v6 }
 0x116   : > { %v373_v11 = vpop.permute.xlu2 %372 }
 0x126   : > { %v293_v7 = vpop.permute.xlu1 %292 }
 0x127   : > { %v214_v8 = vpop.permute.xlu0 %213 }
 0x128   : > { %657 = vmatpush.xpose.msk.msra.mxu1 %vm215_vm1, %v214_v8 }
 0x12b   : > { %658 = vmatmul.msk.f32.vlgmr.msra.gmra.mxu1 %vm215_vm1, %v1032_v5 }
 0x12e   : > { %v375_v9 = vpop.permute.xlu1 %374 }
 0x12f   : > { %v295_v10 = vpop.permute.xlu0 %294  ;;  %663 = vmatpush.xpose.msk.msrb.mxu1 %vm215_vm1, %v375_v9 }
 0x130   : > { %660 = vmatpush.xpose.msk.msra.mxu3 %vm215_vm1, %v295_v10 }
 0x133   : > { %661 = vmatmul.msk.f32.vlgmr.msra.gmra.mxu3 %vm215_vm1, %v293_v7  ;;  %664 = vmatmul.msk.f32.vlgmr.msrb.gmra.mxu1 %vm215_vm1, %v373_v11 }
 0x137   : > { %v453_v12 = vpop.permute.xlu0 %452 }
 0x138   : > { %667 = vmatmul.msk.f32.vlgmr.msrb.gmra.mxu0 %vm215_vm1, %v453_v12 }
 0x1a8   : > { %v237_v16 = vpop.f32.mrf.mxu1 }
 0x1a9   : > { %v240_v17 = vmul.f32 0.35355338, %v237_v16 }
 0x1ab   : > { %v241_v18 = vsel %vm211_vm2, %v240_v17, -1e+30 }
 0x1ac   : > { %v242_v19 = vsel %vm215_vm1, %v241_v18, -inf }
 0x1ad   : > { %243 = vmax.xlane.f32.xlu1 %v242_v19 }
 0x1b0   : > { %v397_v20 = vpop.f32.mrf.mxu1 }
 0x1b1   : > { %v400_v21 = vmul.f32 0.35355338, %v397_v20 }
 0x1b3   : > { %v401_v22 = vsel %vm211_vm2, %v400_v21, -1e+30 }
 0x1b4   : > { %v402_v23 = vsel %vm215_vm1, %v401_v22, -inf }
 0x1b5   : > { %403 = vmax.xlane.f32.xlu0 %v402_v23  ;;  %v477_v26 = vpop.f32.mrf.mxu0 }
 0x1b6   : > { %v317_v24 = vpop.f32.mrf.mxu3  ;;  %v480_v29 = vmul.f32 0.35355338, %v477_v26 }
 0x1b7   : > { %v320_v25 = vmul.f32 0.35355338, %v317_v24 }
 0x1b8   : > { %v481_v30 = vsel %vm211_vm2, %v480_v29, -1e+30 }
 0x1b9   : > { %v321_v27 = vsel %vm211_vm2, %v320_v25, -1e+30  ;;  %v482_v31 = vsel %vm215_vm1, %v481_v30, -inf }
 0x1ba   : > { %v322_v28 = vsel %vm215_vm1, %v321_v27, -inf }
 0x1bb   : > { %323 = vmax.xlane.f32.xlu2 %v322_v28 }
 0x1c3   : > { %483 = vmax.xlane.f32.xlu2 %v482_v31 }
 0x1c9   : > { %346 = vrot.lane.b32.xlu0 %v1032_v5, %s904_s18  ;;  %s842_s18 = scalar_lea.hbm %s1128_s2, 16 }
 0x1ca   : > { %p844_p8 = scmp.lt.s32.totalorder %s842_s18, %s838_s14 }
 0x1cc   : > { %p845_p7 = por %p844_p8, %p843_p12 }
 0x1ce   : > { %p846_p9 = pnand %p845_p7, %p841_p5 }
 0x220   : > { %v244_v32 = vpop.xlane.xlu1 %243 }
 0x221   : > { %v245_v33 = vsub.f32 %v241_v18, %v244_v32 }
 0x223   : > { %v246_v34 = vmul.f32 1.442695, %v245_v33 }
 0x225   : > { %746 = vpow2.f32 %v246_v34 }
 0x228   : > { %v404_v35 = vpop.xlane.xlu0 %403 }
 0x229   : > { %v405_v36 = vsub.f32 %v401_v22, %v404_v35 }
 0x22b   : > { %v747_v37 = vpop.eup %746  ;;  %v406_v38 = vmul.f32 1.442695, %v405_v36 }
 0x22c   : > { %v248_v39 = vsel %vm215_vm1, %v747_v37, 0.0 }
 0x22d   : > { %748 = vpow2.f32 %v406_v38  ;;  %249 = vadd.xlane.f32.xlu1 %v248_v39 }
 0x22e   : > { %v324_v40 = vpop.xlane.xlu2 %323 }
 0x22f   : > { %v325_v41 = vsub.f32 %v321_v27, %v324_v40 }
 0x231   : > { %v326_v42 = vmul.f32 1.442695, %v325_v41 }
 0x233   : > { %v1060_v43 = vpop.eup %748  ;;  %750 = vpow2.f32 %v326_v42 }
 0x234   : > { %v408_v44 = vsel %vm215_vm1, %v1060_v43, 0.0 }
 0x235   : > { %409 = vadd.xlane.f32.xlu0 %v408_v44 }
 0x236   : > { %v484_v45 = vpop.xlane.xlu2 %483 }
 0x237   : > { %v485_v46 = vsub.f32 %v481_v30, %v484_v45 }
 0x239   : > { %v1064_v47 = vpop.eup %750  ;;  %v486_v48 = vmul.f32 1.442695, %v485_v46 }
 0x23a   : > { %v328_v49 = vsel %vm215_vm1, %v1064_v47, 0.0 }
 0x23b   : > { %752 = vpow2.f32 %v486_v48  ;;  %329 = vadd.xlane.f32.xlu2 %v328_v49  ;;  %v347_v53 = vpop.permute.xlu0 %346 }
 0x241   : > { %v1068_v50 = vpop.eup %752 }
 0x242   : > { %v488_v51 = vsel %vm215_vm1, %v1068_v50, 0.0 }
 0x243   : > { %489 = vadd.xlane.f32.xlu1 %v488_v51 }
 0x249   : > { %506 = vrot.lane.b32.xlu0 %v1032_v5, %s905_s19 }
 0x253   : > { %266 = vrot.lane.b32.xlu2 %v1032_v5, %s906_s20 }
 0x25c   : > { %426 = vrot.lane.b32.xlu1 %v1032_v5, %s907_s21 }
 0x2a0   : > { %v250_v52 = vpop.xlane.xlu1 %249 }
 0x2a1   : > { %754 = vrcp.f32 %v250_v52  ;;  %v262_v59 = vand.u32 2147483648, %v250_v52  ;;  %vm256_vm4 = vweird.f32 %v250_v52  ;;  %v260_v62 = vand.u32 2147483647, %v250_v52 }
 0x2a3   : > { %v263_v0 = vor.u32 1.1754944e-38, %v262_v59  ;;  %vm261_vm6 = vcmp.eq.f32.partialorder %v260_v62, 8.507059e+37 }
 0x2a7   : > { %v755_v54 = vpop.eup %754 }
 0x2a8   : > { %v252_v55 = vmul.f32 %v755_v54, %v250_v52  ;;  %v1075_v57 = vpop.xlane.xlu0 %409  ;;  %vm257_vm3 = vweird.f32 %v755_v54 }
 0x2a9   : > { %756 = vrcp.f32 %v1075_v57  ;;  %vm258_vm5 = vmor %vm256_vm4, %vm257_vm3  ;;  %v422_v29 = vand.u32 2147483648, %v1075_v57  ;;  %vm416_vm15 = vweird.f32 %v1075_v57  ;;  %v420_v31 = vand.u32 2147483647, %v1075_v57 }
 0x2aa   : > { %v253_v56 = vsub.f32 1.0, %v252_v55 }
 0x2ab   : > { %v423_v36 = vor.u32 1.1754944e-38, %v422_v29  ;;  %vm421_vm4 = vcmp.eq.f32.partialorder %v420_v31, 8.507059e+37 }
 0x2ac   : > { %v254_v58 = vmul.f32 %v755_v54, %v253_v56 }
 0x2ae   : > { %v330_v60 = vpop.xlane.xlu2 %329  ;;  %v255_v61 = vadd.f32 %v755_v54, %v254_v58 }
 0x2af   : > { %758 = vrcp.f32 %v330_v60  ;;  %v757_v2 = vpop.eup %756  ;;  %v342_v10 = vand.u32 2147483648, %v330_v60  ;;  %v340_v12 = vand.u32 2147483647, %v330_v60  ;;  %vm336_vm8 = vweird.f32 %v330_v60 }
 0x2b0   : > { %v259_v63 = vsel %vm258_vm5, %v755_v54, %v255_v61  ;;  %v412_v8 = vmul.f32 %v757_v2, %v1075_v57  ;;  %vm417_vm12 = vweird.f32 %v757_v2  ;;  %vm545_vm5 = vcmask 130048  }
 0x2b1   : > { %v264_v1 = vsel %vm261_vm6, %v263_v0, %v259_v63  ;;  %v343_v17 = vor.u32 1.1754944e-38, %v342_v10  ;;  %vm341_vm10 = vcmp.eq.f32.partialorder %v340_v12, 8.507059e+37  ;;  %vm418_vm3 = vmor %vm416_vm15, %vm417_vm12  ;;  %vm547_vm6 = vcmask 195584  }
 0x2b2   : > { %v265_v7 = vmul.f32 %v747_v37, %v264_v1  ;;  %v413_v14 = vsub.f32 1.0, %v412_v8 }
 0x2b4   : > { %v414_v21 = vmul.f32 %v757_v2, %v413_v14 }
 0x2b5   : > { %v759_v3 = vpop.eup %758 }
 0x2b6   : > { %v332_v4 = vmul.f32 %v759_v3, %v330_v60  ;;  %v490_v5 = vpop.xlane.xlu1 %489  ;;  %v267_v6 = vpop.permute.xlu2 %266  ;;  %vm337_vm7 = vweird.f32 %v759_v3  ;;  %v415_v27 = vadd.f32 %v757_v2, %v414_v21 }
 0x2b7   : > { %760 = vrcp.f32 %v490_v5  ;;  %287 = vmatpush.msra.mxu2 %v267_v6  ;;  %vm338_vm9 = vmor %vm336_vm8, %vm337_vm7  ;;  %v502_v24 = vand.u32 2147483648, %v490_v5  ;;  %v500_v26 = vand.u32 2147483647, %v490_v5  ;;  %vm496_vm13 = vweird.f32 %v490_v5 }
 0x2b8   : > { %v333_v9 = vsub.f32 1.0, %v332_v4  ;;  %659 = vmatmul.msk.f32.vlgmr.msra.gmra.mxu2 %vm215_vm1, %v265_v7  ;;  %v419_v35 = vsel %vm418_vm3, %v757_v2, %v415_v27 }
 0x2b9   : > { %367 = vmatpush.msrb.mxu2 %v347_v53  ;;  %v503_v30 = vor.u32 1.1754944e-38, %v502_v24  ;;  %vm501_vm2 = vcmp.eq.f32.partialorder %v500_v26, 8.507059e+37  ;;  %v424_v37 = vsel %vm421_vm4, %v423_v36, %v419_v35 }
 0x2ba   : > { %v334_v11 = vmul.f32 %v759_v3, %v333_v9  ;;  %v425_v39 = vmul.f32 %v1060_v43, %v424_v37 }
 0x2bb   : > { %v507_v13 = vpop.permute.xlu0 %506 }
 0x2bc   : > { %v335_v15 = vadd.f32 %v759_v3, %v334_v11  ;;  %527 = vmatpush.msra.mxu2 %v507_v13 }
 0x2bd   : > { %v761_v16 = vpop.eup %760 }
 0x2be   : > { %v492_v18 = vmul.f32 %v761_v16, %v490_v5  ;;  %v339_v19 = vsel %vm338_vm9, %v759_v3, %v335_v15  ;;  %vm497_vm11 = vweird.f32 %v761_v16 }
 0x2bf   : > { %v344_v20 = vsel %vm341_vm10, %v343_v17, %v339_v19  ;;  %vm498_vm14 = vmor %vm496_vm13, %vm497_vm11 }
 0x2c0   : > { %v493_v22 = vsub.f32 1.0, %v492_v18  ;;  %v345_v23 = vmul.f32 %v1064_v47, %v344_v20 }
 0x2c2   : > { %v494_v25 = vmul.f32 %v761_v16, %v493_v22  ;;  %662 = vmatmul.msk.f32.vlgmr.msrb.gmra.mxu2 %vm215_vm1, %v345_v23 }
 0x2c4   : > { %v495_v28 = vadd.f32 %v761_v16, %v494_v25 }
 0x2c6   : > { %v499_v32 = vsel %vm498_vm14, %v761_v16, %v495_v28 }
 0x2c7   : > { %v504_v33 = vsel %vm501_vm2, %v503_v30, %v499_v32 }
 0x2c8   : > { %v505_v34 = vmul.f32 %v1068_v50, %v504_v33 }
 0x2ca   : > { %668 = vmatmul.msk.f32.vlgmr.msra.gmra.mxu2 %vm215_vm1, %v505_v34 }
 0x2ce   : > { %v427_v38 = vpop.permute.xlu1 %426 }
 0x2cf   : > { %447 = vmatpush.msrb.mxu3 %v427_v38 }
 0x2d0   : > { %665 = vmatmul.msk.f32.vlgmr.msrb.gmra.mxu3 %vm215_vm1, %v425_v39 }
 0x33b   : > { %v289_v40 = vpop.f32.mrf.mxu2 }
 0x345   : > { %v369_v41 = vpop.f32.mrf.mxu2 }
 0x346   : > { %533 = vrot.lane.b32.xlu2 %v369_v41, %s908_s22 }
 0x34d   : > { %v529_v42 = vpop.f32.mrf.mxu2 }
 0x34e   : > { %541 = vrot.lane.b32.xlu0 %v529_v42, %s909_s24 }
 0x353   : > { %v449_v44 = vpop.f32.mrf.mxu3 }
 0x354   : > { %537 = vrot.lane.b32.xlu1 %v449_v44, %s910_s25 }
 0x3a0   : > { %v534_v43 = vpop.permute.xlu2 %533 }
 0x3a1   : > { %v544_v45 = vsel %vm215_vm1, %v289_v40, %v534_v43 }
 0x3c0   : > { %v542_v47 = vpop.permute.xlu0 %541 }
 0x3c6   : > { %v538_v46 = vpop.permute.xlu1 %537 }
 0x3c7   : > { %v546_v48 = vsel %vm545_vm5, %v544_v45, %v538_v46 }
 0x3c8   : > { %v548_v49 = vsel %vm547_vm6, %v546_v48, %v542_v47 }
 0x3c9   : > { %549 = vst.msk [vmem:[%s177_s27] sm:$0xff] %vm183_vm0, %v548_v49 }
 0x3ca   : > { %849 = shalt.err (!%p846_p9)
}
 0x3cb   : > { %679 = dma.vmem_to_hbm [thread:$0]  (%p986_p13), %s564_s7, 128, %s566_s8, %s551_s16  }
 0x3cc PF: > { %s577_s29 = sand.u32 1, %s880_s9   ;;  %p1134_p10 = scmp.ge.s32.totalorder %s892_s12, 2 }
 0x3cd   : > { %s578_s21 = scalar_lea.sflag [#allocation4], %s577_s29 }
 0x3ce   : > { %p690_p11 = pnand %p1134_p10, %p991_p4 }
 0x3d0   : > { %p691_p0 = pneg %p690_p11 }
 0x3d2   : > { %875 = dma.done.wait (%p691_p0), %s578_s21, 128  }
 0x3d3   : > { %877 = vsyncadd (%p691_p0), %s578_s21, 4294967168  ;;  %p16_p2 = scmp.ge.s32.totalorder %s966_s23, 4   ;;  %s1135_s9 = smov %s884_s10 }
 0x3d4   : > { %s1136_s10 = smov %s888_s11  ;;  %s1137_s11 = smov %s978_s26 }
 0x3d5   : > { %s1138_s12 = smov %s966_s23  ;;  %18 = sbr.rel (!%p16_p2) target bundleno = 6 (0x6), region = 77 }
 0x3da   :  { %584 = vsyncpa [#allocation3], 1 }
 0x3db   :  { %586 = vsyncpa [#allocation3 + $0x1], 1 }
 0x3dc   :  { %587 = vsyncpa [#allocation6], 1 }
 0x3dd   :  { %588 = vsyncpa [#allocation4], 1 }
 0x3de   :  { %590 = vsyncpa [#allocation4 + $0x1], 1 }

</bundles_post_ra>
